<compile_context>
chip_gen: v7x
topology: tpu7x:2x2x1
jax: 0.10.0
libtpu: 0.0.40
codegen_flags: <defaults>
</compile_context>

<pallas_src>
import jax
import jax.numpy as jnp
from jax.experimental import pallas as pl
from jax.experimental.pallas import tpu as pltpu


# ----------------------------- helpers ---------------------------------------
def _round_up(x, m):
    return ((x + m - 1) // m) * m


def _choose_tiles(B, D, itemsize):
    # Rows: keep the whole (8-padded) batch per block, up to 128 rows.
    tile_b = min(_round_up(B, 8), 128)
    # Lanes: target ~2 MiB per input buffer (double-buffered -> ~4 MiB), which
    # stays well inside v7x's 64 MiB VMEM, but keep >= 512 lanes to amortize
    # the ~0.35 us/step grid overhead.
    target_bytes = 2 * 1024 * 1024
    tile_d = max(512, (target_bytes // (tile_b * itemsize)) // 128 * 128)
    tile_d = min(tile_d, _round_up(D, 128))
    return tile_b, tile_d


# ----------------------------- Pallas kernel ---------------------------------
def _gp_rowloss_kernel(g_ref, o_ref, acc_ref):
    # g_ref:   (TILE_B, TILE_D) gradient tile (native dtype)
    # o_ref:   (TILE_B, 1) f32 per-row (||g|| - 1)^2
    # acc_ref: (TILE_B, 1) f32 running sum-of-squares (VMEM scratch)
    k = pl.program_id(1)

    @pl.when(k == 0)
    def _():
        acc_ref[...] = jnp.zeros_like(acc_ref)

    g = g_ref[...].astype(jnp.float32)  # per-tile upcast; f32 accumulation
    acc_ref[...] += jnp.sum(g * g, axis=1, keepdims=True)

    @pl.when(k == pl.num_programs(1) - 1)
    def _():
        # TODO(synk): forward matches torch exactly; if this loss is ever
        # differentiated, consider sqrt(acc + eps) to avoid NaN grads at 0.
        norm = jnp.sqrt(acc_ref[...])               # (TILE_B, 1)
        o_ref[...] = (norm - 1.0) ** 2


def _gp_row_sqerr_pallas(grad_2d):
    """Per-row (||grad||_2 - 1)^2 for a (B, D) gradient, returned as (B_pad, 1) f32."""
    B, D = grad_2d.shape
    itemsize = grad_2d.dtype.itemsize
    tile_b, tile_d = _choose_tiles(B, D, itemsize)

    b_pad = _round_up(B, tile_b)
    d_pad = _round_up(D, tile_d)
    if (b_pad, d_pad) != (B, D):
        # Zero padding is exact for sum-of-squares; padded rows are sliced off
        # before the mean in the wrapper.
        grad_2d = jnp.pad(grad_2d, ((0, b_pad - B), (0, d_pad - D)))

    nb = b_pad // tile_b
    nd = d_pad // tile_d

    return pl.pallas_call(
        _gp_rowloss_kernel,
        out_shape=jax.ShapeDtypeStruct((b_pad, 1), jnp.float32),
        grid_spec=pltpu.PrefetchScalarGridSpec(
            num_scalar_prefetch=0,
            grid=(nb, nd),  # reduction axis last
            in_specs=[pl.BlockSpec((tile_b, tile_d), lambda i, k: (i, k))],
            out_specs=pl.BlockSpec((tile_b, 1), lambda i, k: (i, 0)),
            scratch_shapes=[pltpu.VMEM((tile_b, 1), jnp.float32)],
        ),
        compiler_params=pltpu.CompilerParams(
            dimension_semantics=("parallel", "arbitrary"),
            vmem_limit_bytes=32 * 1024 * 1024,
        ),
        cost_estimate=pl.CostEstimate(
            flops=2 * b_pad * d_pad,
            transcendentals=b_pad,
            bytes_accessed=b_pad * d_pad * itemsize + b_pad * 4,
        ),
    )(grad_2d)


# ------------------------------ Module wrapper --------------------------------
def gradient_penalty_loss(critic_fn, interp):
    """Equivalent of GradientPenaltyLoss.forward(interp, interp_crit) where
    interp_crit = critic_fn(interp)."""
    # torch.autograd.grad(outputs=interp_crit, inputs=interp, grad_outputs=ones)
    # is autodiff glue with no Pallas equivalent; done with jax.vjp here.
    interp_crit, vjp_fn = jax.vjp(critic_fn, interp)
    grad_outputs = jnp.ones_like(interp_crit)            # get_grad_outputs(...)
    (grad_interp,) = vjp_fn(grad_outputs)

    B = grad_interp.shape[0]
    grad_2d = grad_interp.reshape(B, -1)                 # view(B, -1); keep native dtype

    per_row = _gp_row_sqerr_pallas(grad_2d)              # (B_pad, 1) f32, kernel hot path
    return jnp.mean(per_row[:B, 0])                      # tiny O(B) epilogue in the wrapper


# ------------------------------------ main ------------------------------------
if __name__ == "__main__":
    key = jax.random.PRNGKey(0)
    k_x, k_w = jax.random.split(key)

    # Small deterministic inputs: interp is NCHW (B=2, C=4, H=16, W=16)
    B, C, H, W = 2, 4, 16, 16
    interp = jax.random.normal(k_x, (B, C, H, W), dtype=jnp.float32)

    # Deterministic toy critic (stand-in for the graph that produced interp_crit
    # in the PyTorch module): per-sample scalar score.
    w = jax.random.normal(k_w, (1, C, 1, 1), dtype=jnp.float32)

    def critic_fn(x):
        return jnp.sum(jnp.tanh(x) * w, axis=(1, 2, 3))   # (B,)

    loss_fn = jax.jit(lambda x: gradient_penalty_loss(critic_fn, x))
    loss = loss_fn(interp)
    jax.block_until_ready(loss)

    # Pure-JAX reference check of the kernel math.
    _, vjp_fn = jax.vjp(critic_fn, interp)
    (g_ref,) = vjp_fn(jnp.ones((B,), jnp.float32))
    ref = jnp.mean((jnp.linalg.norm(g_ref.reshape(B, -1), axis=1) - 1.0) ** 2)
    assert jnp.allclose(loss, ref, rtol=1e-5, atol=1e-6), (loss, ref)

    print("KERNEL_OK")
</pallas_src>

<mosaic_0001>
module attributes {stable_mosaic.version = 11 : i64} {
  func.func @_gp_rowloss_kernel(%arg0: i32, %arg1: i32, %arg2: memref<8x1024xf32, #tpu.memory_space<vmem>>, %arg3: memref<8x1xf32, #tpu.memory_space<vmem>>, %arg4: memref<8x1xf32, #tpu.memory_space<vmem>>) attributes {dimension_semantics = [#tpu.dimension_semantics<parallel>, #tpu.dimension_semantics<arbitrary>], iteration_bounds = array<i64: 1, 1>, scalar_prefetch = 0 : i64, scratch_operands = 1 : i64, tpu.core_type = #tpu.core_type<tc>, window_params = [{transform_indices = @transform_0, window_bounds = array<i64: 8, 1024>}, {transform_indices = @transform_1, window_bounds = array<i64: 8, 1>}]} {
    %c0_i32 = arith.constant 0 : i32
    %0 = arith.cmpi eq, %arg1, %c0_i32 : i32
    %1 = arith.extui %0 : i1 to i32
    %c0_i32_0 = arith.constant 0 : i32
    %2 = arith.cmpi ne, %1, %c0_i32_0 : i32
    scf.if %2 {
      %cst_8 = arith.constant 0.000000e+00 : f32
      %13 = vector.broadcast %cst_8 : f32 to vector<8x1xf32>
      %c0_9 = arith.constant 0 : index
      %c0_10 = arith.constant 0 : index
      %14 = vector.load %arg4[%c0_9, %c0_10] : memref<8x1xf32, #tpu.memory_space<vmem>>, vector<8x1xf32>
      tpu.vector_store %arg4[%c0_9, %c0_10], %13 {strides = array<i32>} : memref<8x1xf32, #tpu.memory_space<vmem>>, vector<8x1xf32>,
    } else {
    }
    %c0 = arith.constant 0 : index
    %c0_1 = arith.constant 0 : index
    %3 = vector.load %arg2[%c0, %c0_1] : memref<8x1024xf32, #tpu.memory_space<vmem>>, vector<8x1024xf32>
    %c0_2 = arith.constant 0 : index
    %c0_3 = arith.constant 0 : index
    %4 = vector.load %arg4[%c0_2, %c0_3] : memref<8x1xf32, #tpu.memory_space<vmem>>, vector<8x1xf32>
    %5 = arith.mulf %3, %3 : vector<8x1024xf32>
    %cst = arith.constant dense<0.000000e+00> : vector<8xf32>
    %6 = vector.multi_reduction <add>, %5, %cst [1] : vector<8x1024xf32> to vector<8xf32>
    %7 = vector.shape_cast %6 : vector<8xf32> to vector<8x1xf32>
    %8 = arith.addf %4, %7 : vector<8x1xf32>
    %c0_4 = arith.constant 0 : index
    %c0_5 = arith.constant 0 : index
    %9 = vector.load %arg4[%c0_4, %c0_5] : memref<8x1xf32, #tpu.memory_space<vmem>>, vector<8x1xf32>
    tpu.vector_store %arg4[%c0_4, %c0_5], %8 {strides = array<i32>} : memref<8x1xf32, #tpu.memory_space<vmem>>, vector<8x1xf32>,
    %c0_i32_6 = arith.constant 0 : i32
    %10 = arith.cmpi eq, %arg1, %c0_i32_6 : i32
    %11 = arith.extui %10 : i1 to i32
    %c0_i32_7 = arith.constant 0 : i32
    %12 = arith.cmpi ne, %11, %c0_i32_7 : i32
    scf.if %12 {
      %c0_8 = arith.constant 0 : index
      %c0_9 = arith.constant 0 : index
      %13 = vector.load %arg4[%c0_8, %c0_9] : memref<8x1xf32, #tpu.memory_space<vmem>>, vector<8x1xf32>
      %14 = math.sqrt %13 : vector<8x1xf32>
      %cst_10 = arith.constant 1.000000e+00 : f32
      %15 = vector.broadcast %cst_10 : f32 to vector<8x1xf32>
      %16 = arith.subf %14, %15 : vector<8x1xf32>
      %17 = arith.mulf %16, %16 : vector<8x1xf32>
      %c0_11 = arith.constant 0 : index
      %c0_12 = arith.constant 0 : index
      %18 = vector.load %arg3[%c0_11, %c0_12] : memref<8x1xf32, #tpu.memory_space<vmem>>, vector<8x1xf32>
      tpu.vector_store %arg3[%c0_11, %c0_12], %17 {strides = array<i32>} : memref<8x1xf32, #tpu.memory_space<vmem>>, vector<8x1xf32>,
    } else {
    }
    return
  }
  func.func @transform_0(%arg0: i32, %arg1: i32) -> (i32, i32) {
    %c0_i32 = arith.constant 0 : i32
    return %arg0, %arg1 : i32, i32
  }
  func.func @transform_1(%arg0: i32, %arg1: i32) -> (i32, i32) {
    %c0_i32 = arith.constant 0 : i32
    %c0_i32_0 = arith.constant 0 : i32
    return %arg0, %c0_i32 : i32, i32
  }
}

</mosaic_0001>

<bundles_post_ra>
// kernel: _lambda_.1
= control target key start
LH: loop header
LB: loop body
LE: loop exit
PB: predicated region body
PF: predicated region fallthrough
CT: control target
= control target key end

     0   :  { %vm12_vm0 = vcmask 7168   ;;  %v65_v3 = vmov 0.0   ;;  %s106_s0 = inlined_call_operand.vmem [shape: f32[8,1024], index: 0, kind: input, shape index: {}]   ;;  %s107_s1 = inlined_call_operand.vmem [shape: f32[8,1], index: 1, kind: output, shape index: {}]  }
   0x1   :  { %v14_v0 = vld [vmem:[%s106_s0] sm:$0xff]  ;;  %v15_v1 = vld [vmem:[%s106_s0 + $0x8] sm:$0xff]  ;;  %v16_v2 = vld [vmem:[%s106_s0 + $0x10] sm:$0xff]  ;;  %13 = vst.msk [vmem:[#allocation2] sm:$0xff] %vm12_vm0, %v65_v3 }
   0x2   :  { %v17_v4 = vld [vmem:[%s106_s0 + $0x18] sm:$0xff]  ;;  %v23_v5 = vmul.f32 %v14_v0, %v14_v0  ;;  %v24_v6 = vmul.f32 %v15_v1, %v15_v1  ;;  %v25_v7 = vmul.f32 %v16_v2, %v16_v2  ;;  %v18_v8 = vld [vmem:[%s106_s0 + $0x20] sm:$0xff]  ;;  %v19_v11 = vld [vmem:[%s106_s0 + $0x28] sm:$0xff] }
   0x3   :  { %v26_v9 = vmul.f32 %v17_v4, %v17_v4  ;;  %v27_v12 = vmul.f32 %v18_v8, %v18_v8  ;;  %v20_v14 = vld [vmem:[%s106_s0 + $0x30] sm:$0xff]  ;;  %v28_v15 = vmul.f32 %v19_v11, %v19_v11  ;;  %v21_v17 = vld [vmem:[%s106_s0 + $0x38] sm:$0xff] }
   0x4   :  { %v31_v10 = vadd.f32 %v24_v6, %v23_v5  ;;  %v29_v18 = vmul.f32 %v20_v14, %v20_v14  ;;  %v30_v20 = vmul.f32 %v21_v17, %v21_v17 }
   0x6   :  { %v32_v13 = vadd.f32 %v31_v10, %v25_v7 }
   0x8   :  { %v33_v16 = vadd.f32 %v32_v13, %v26_v9  ;;  %v22_v24 = vld [vmem:[#allocation2] sm:$0xff] }
   0xa   :  { %v34_v19 = vadd.f32 %v33_v16, %v27_v12 }
   0xc   :  { %v35_v21 = vadd.f32 %v34_v19, %v28_v15 }
   0xe   :  { %v36_v22 = vadd.f32 %v35_v21, %v29_v18 }
  0x10   :  { %v37_v23 = vadd.f32 %v36_v22, %v30_v20 }
  0x12   :  { %38 = vadd.xlane.f32.xlu0 %v37_v23 }
  0x9f   :  { %v39_v25 = vpop.xlane.xlu0 %38 }
  0xa0   :  { %v40_v26 = vadd.f32 %v39_v25, %v22_v24 }
  0xa2   :  { %42 = vst.msk [vmem:[#allocation2] sm:$0xff] %vm12_vm0, %v40_v26 }
  0xa9   :  { %v46_v27 = vld [vmem:[#allocation2] sm:$0xff] }
  0xaa   :  { %63 = vrsqrt.f32 %v46_v27  ;;  %vm49_vm1 = vcmp.eq.f32.partialorder %v46_v27, inf  ;;  %v52_v30 = vand.u32 2147483648, %v46_v27  ;;  %vm51_vm2 = vcmp.eq.f32.partialorder %v46_v27, 0.0 }
  0xb4   :  { %v64_v28 = vpop.eup %63 }
  0xb5   :  { %v48_v29 = vmul.f32 %v64_v28, %v46_v27 }
  0xb7   :  { %v50_v31 = vsel %vm49_vm1, %v46_v27, %v48_v29 }
  0xb8   :  { %v53_v32 = vsel %vm51_vm2, %v52_v30, %v50_v31 }
  0xb9   :  { %v61_v33 = vadd.f32 -1.0, %v53_v32 }
  0xbb   :  { %v55_v34 = vmul.f32 %v61_v33, %v61_v33 }
  0xbd   :  { %56 = vst.msk [vmem:[%s107_s1] sm:$0xff] %vm12_vm0, %v55_v34 }

</bundles_post_ra>
